<compile_context>
chip_gen: v7x
topology: tpu7x:2x2x1
jax: 0.10.0
libtpu: 0.0.40
codegen_flags: <defaults>
</compile_context>

<pallas_src>
import numpy as np
import jax
import jax.numpy as jnp
from jax.experimental import pallas as pl
from jax.experimental.pallas import tpu as pltpu

H, W = 64, 3          # spatial size implied by the module's forward()
HW = H * W            # 192


# --------------------------------------------------------------------------------------
# Glue: lower the convs to dense matrices (out_flat = x_flat @ M).
# --------------------------------------------------------------------------------------
def _conv3x3_matrix(k):
    """1->1 channel 3x3 conv, padding=1, on (H, W) = (64, 3), as a (192, 192) matrix."""
    k = np.asarray(k, np.float32)
    m = np.zeros((HW, HW), np.float32)
    for h in range(H):
        for w in range(W):
            for dh in (-1, 0, 1):
                for dw in (-1, 0, 1):
                    hh, ww = h + dh, w + dw
                    if 0 <= hh < H and 0 <= ww < W:
                        m[hh * W + ww, h * W + w] = k[dh + 1, dw + 1]
    return m


def _conv1x1_matrix(w3):
    """After x.transpose(1,3), W (=3) becomes channels: out[b, h] = sum_w w3[w]*x[b, h, w]."""
    w3 = np.asarray(w3, np.float32)
    m = np.zeros((HW, H), np.float32)
    for h in range(H):
        for w in range(W):
            m[h * W + w, h] = w3[w]
    return m


# --------------------------------------------------------------------------------------
# Pallas kernel: one grid step == one full forward() call on a whole batch.
#   x_ref    (B, 192)    f32   flattened input for this call (cast to bf16 in-kernel)
#   m1_ref   (192, 256)  bf16  conv1: cols 0:192 conv matrix, col 192 = row-sums, rest zero
#   m2_ref   (256, 256)  bf16  conv2: rows 192:256 zero (kill stats/pad lanes), same col layout
#   m3_ref   (256, 128)  bf16  conv3 (1x1 over transposed W): cols 0:64 conv, col 64 = sums
#   wh_ref   (128, 128)  bf16  fused head: rows 0:64 = [Wf^T | Wf^T Wfc^T | 0], rows 64:128 zero
#   bh_ref   (1, 128)    f32   fused head bias: [bf | bf Wfc^T + bfc | 0]
#   out_ref  (B, 128)    f32   [feat (64) | y (2) | zeros (62)]  (lane-dense, unmasked store)
# --------------------------------------------------------------------------------------
def _fa2_kernel(x_ref, m1_ref, m2_ref, m3_ref, wh_ref, bh_ref, out_ref):

    def bn_lrelu(h_ext, n_real, sum_lane):
        # BatchNorm2d, single channel, train-mode whole-batch stats (biased var), eps=1e-5,
        # affine at PyTorch defaults (gamma=1, beta=0).  Real data lives in lanes [0, n_real);
        # lane `sum_lane` holds the per-row sum of the real lanes (from the MXU); other lanes 0.
        n = h_ext.shape[0] * n_real
        sumcol = h_ext[:, sum_lane:sum_lane + 1]                 # (B, 1) — cheap lane extract
        mu = jnp.sum(sumcol) / n                                 # tiny sublane reduction
        ss = jnp.sum(h_ext * h_ext) - jnp.sum(sumcol * sumcol)   # one full reduction + correction
        var = ss / n - mu * mu
        hn = (h_ext - mu) * jax.lax.rsqrt(var + 1e-5)
        return jnp.maximum(hn, 0.01 * hn)                        # LeakyReLU(0.01)

    x = x_ref[...].astype(jnp.bfloat16)                          # (B, 192)
    # Conv biases omitted on purpose: constant add before single-channel BN is a no-op.
    h1 = jnp.dot(x, m1_ref[...], preferred_element_type=jnp.float32)     # (B, 256)
    h1 = bn_lrelu(h1, HW, HW).astype(jnp.bfloat16)
    h2 = jnp.dot(h1, m2_ref[...], preferred_element_type=jnp.float32)    # (B, 256)
    h2 = bn_lrelu(h2, HW, HW).astype(jnp.bfloat16)
    h3 = jnp.dot(h2, m3_ref[...], preferred_element_type=jnp.float32)    # (B, 128)
    h3 = bn_lrelu(h3, H, H).astype(jnp.bfloat16)
    # Fused lane-dense head: cols 0:64 = feat, cols 64:66 = y, rest zero.
    out_ref[...] = (jnp.dot(h3, wh_ref[...], preferred_element_type=jnp.float32)
                    + bh_ref[...])


# --------------------------------------------------------------------------------------
# Wrappers.
# --------------------------------------------------------------------------------------
def feature_aggregator2_calls(x_calls, params):
    """x_calls: (C, B, 1, 64, 3) f32 — C independent module invocations, each on a batch of B.
    Returns (feat (C,B,64), y (C,B,2)).  BN statistics are per-call whole-batch (train mode)."""
    C, B = x_calls.shape[0], x_calls.shape[1]
    x_flat = jnp.reshape(x_calls.astype(jnp.float32), (C, B, HW))    # free reshape, no cast hop

    w = params
    resident = lambda arr: pl.BlockSpec(arr.shape, lambda i: (0,) * arr.ndim)

    out = pl.pallas_call(
        _fa2_kernel,
        out_shape=jax.ShapeDtypeStruct((C, B, 128), jnp.float32),
        grid=(C,),
        in_specs=[
            pl.BlockSpec((None, B, HW), lambda i: (i, 0, 0)),         # x: per-call block
            resident(w["m1"]), resident(w["m2"]), resident(w["m3"]),  # weights: DMA'd once,
            resident(w["w_head"]), resident(w["b_head"]),             # VMEM-resident across grid
        ],
        out_specs=pl.BlockSpec((None, B, 128), lambda i: (i, 0, 0)),
        compiler_params=pltpu.CompilerParams(
            dimension_semantics=("parallel",)),                       # v7x: shard calls over TCs
    )(x_flat, w["m1"], w["m2"], w["m3"], w["w_head"], w["b_head"])

    feat = out[..., :H]          # (C, B, 64)
    y = out[..., H:H + 2]        # (C, B, 2)
    return feat, y


def feature_aggregator2(x, params):
    """Single call: x (B, 1, 64, 3) -> (feat (B,64), y (B,2)), like the PyTorch module."""
    feat, y = feature_aggregator2_calls(x[None], params)
    return feat[0], y[0]


# --------------------------------------------------------------------------------------
# Deterministic parameter init (shapes from __init__); BN affine at PyTorch defaults (1, 0).
# --------------------------------------------------------------------------------------
def init_params(key):
    ks = jax.random.split(key, 10)
    u = lambda k, shape, bound: jax.random.uniform(k, shape, jnp.float32, -bound, bound)
    k1 = u(ks[0], (3, 3), 1.0 / 3.0);  b1 = u(ks[1], (), 1.0 / 3.0)         # Conv2d(1,1,3)
    k2 = u(ks[2], (3, 3), 1.0 / 3.0);  b2 = u(ks[3], (), 1.0 / 3.0)         # Conv2d(1,1,3)
    w3 = u(ks[4], (3,), 1.0 / np.sqrt(3.0)); b3 = u(ks[5], (), 1.0 / np.sqrt(3.0))  # Conv2d(3,1,1)
    wf = u(ks[6], (64, 64), 1.0 / 8.0); bf = u(ks[7], (64,), 1.0 / 8.0)     # Linear(64,64)
    wfc = u(ks[8], (2, 64), 1.0 / 8.0); bfc = u(ks[9], (2,), 1.0 / 8.0)     # Linear(64,2)

    base1 = _conv3x3_matrix(np.asarray(k1))          # (192, 192)
    base2 = _conv3x3_matrix(np.asarray(k2))          # (192, 192)
    base3 = _conv1x1_matrix(np.asarray(w3))          # (192, 64)

    # Sum-column extension (mean folded into the MXU) + zero K-rows so the extra lanes of the
    # previous layer never contribute.  Lane padding to 256/128 happens in VMEM anyway.
    m1 = np.zeros((HW, 256), np.float32);  m1[:, :HW] = base1;  m1[:, HW] = base1.sum(1)
    m2 = np.zeros((256, 256), np.float32); m2[:HW, :HW] = base2; m2[:HW, HW] = base2.sum(1)
    m3 = np.zeros((256, 128), np.float32); m3[:HW, :H] = base3;  m3[:HW, H] = base3.sum(1)

    # Fused lane-dense head:
    #   out[:, 0:64]  = feat = h3 @ Wf^T + bf
    #   out[:, 64:66] = y    = feat @ Wfc^T + bfc = h3 @ (Wf^T Wfc^T) + (bf Wfc^T + bfc)
    wf_n, bf_n = np.asarray(wf), np.asarray(bf)
    wfc_n, bfc_n = np.asarray(wfc), np.asarray(bfc)
    w_head = np.zeros((128, 128), np.float32)
    w_head[:H, :H] = wf_n.T
    w_head[:H, H:H + 2] = wf_n.T @ wfc_n.T
    b_head = np.zeros((1, 128), np.float32)
    b_head[0, :H] = bf_n
    b_head[0, H:H + 2] = bf_n @ wfc_n.T + bfc_n

    # Conv biases b1/b2/b3 are NOT packed for the kernel: no-ops before single-channel BN.
    params = dict(
        m1=jnp.asarray(m1, jnp.bfloat16),          # (192, 256)
        m2=jnp.asarray(m2, jnp.bfloat16),          # (256, 256)
        m3=jnp.asarray(m3, jnp.bfloat16),          # (256, 128)
        w_head=jnp.asarray(w_head, jnp.bfloat16),  # (128, 128)
        b_head=jnp.asarray(b_head, jnp.float32),   # (1, 128)
    )
    raw = (k1, b1, k2, b2, w3, b3, wf, bf, wfc, bfc)
    return params, raw


# --------------------------------------------------------------------------------------
# Pure-JAX f32 reference of the PyTorch forward (train-mode BN), for a sanity check.
# --------------------------------------------------------------------------------------
def reference_forward(x, raw):
    k1, b1, k2, b2, w3, b3, wf, bf, wfc, bfc = raw

    def bn_lrelu(v):
        mu = jnp.mean(v)
        var = jnp.mean(jnp.square(v - mu))
        vn = (v - mu) / jnp.sqrt(var + 1e-5)
        return jnp.where(vn >= 0.0, vn, 0.01 * vn)

    def conv3x3(v, k, b):
        return jax.lax.conv_general_dilated(
            v, k.reshape(1, 1, 3, 3), (1, 1), "SAME",
            dimension_numbers=("NCHW", "OIHW", "NCHW"),
            precision=jax.lax.Precision.HIGHEST) + b

    h = bn_lrelu(conv3x3(x, k1, b1))
    h = bn_lrelu(conv3x3(h, k2, b2))
    h = jnp.transpose(h, (0, 3, 2, 1))                                     # x.transpose(1, 3)
    h = jnp.sum(h * w3[None, :, None, None], axis=1, keepdims=True) + b3   # Conv2d(3,1,1)
    h = bn_lrelu(h)
    h = h.reshape(h.shape[0], -1)                                          # (B, 64)
    feat = h @ wf.T + bf
    y = feat @ wfc.T + bfc
    return feat, y


if __name__ == "__main__":
    key = jax.random.PRNGKey(0)
    kp, kx = jax.random.split(key)
    params, raw = init_params(kp)

    C, B = 3, 8                                                 # 3 stacked calls, batch 8 each
    x_calls = jax.random.normal(kx, (C, B, 1, H, W), jnp.float32)   # NCHW per call: (8, 1, 64, 3)

    feat, y = feature_aggregator2_calls(x_calls, params)
    feat, y = jax.block_until_ready((feat, y))
    assert feat.shape == (C, B, 64) and y.shape == (C, B, 2)

    # Per-call check against the pure-f32 reference (bf16 MXU operands -> loose tolerance).
    for c in range(C):
        feat_ref, y_ref = reference_forward(x_calls[c], raw)
        np.testing.assert_allclose(np.asarray(feat[c]), np.asarray(feat_ref),
                                   rtol=2.5e-2, atol=2.5e-2)
        np.testing.assert_allclose(np.asarray(y[c]), np.asarray(y_ref),
                                   rtol=2.5e-2, atol=2.5e-2)

    # Single-call convenience path (grid=(1,)) must agree with the stacked path.
    f1, y1 = feature_aggregator2(x_calls[0], params)
    f1, y1 = jax.block_until_ready((f1, y1))
    np.testing.assert_allclose(np.asarray(f1), np.asarray(feat[0]), rtol=1e-6, atol=1e-6)
    np.testing.assert_allclose(np.asarray(y1), np.asarray(y[0]), rtol=1e-6, atol=1e-6)

    print("KERNEL_OK")
</pallas_src>

<mosaic_0001>
module attributes {stable_mosaic.version = 11 : i64} {
  func.func @_fa2_kernel(%arg0: i32, %arg1: memref<1x8x192xf32, #tpu.memory_space<vmem>>, %arg2: memref<192x256xbf16, #tpu.memory_space<vmem>>, %arg3: memref<256x256xbf16, #tpu.memory_space<vmem>>, %arg4: memref<256x128xbf16, #tpu.memory_space<vmem>>, %arg5: memref<128x128xbf16, #tpu.memory_space<vmem>>, %arg6: memref<1x128xf32, #tpu.memory_space<vmem>>, %arg7: memref<1x8x128xf32, #tpu.memory_space<vmem>>) attributes {dimension_semantics = [#tpu.dimension_semantics<parallel>], iteration_bounds = array<i64: 3>, scalar_prefetch = 0 : i64, scratch_operands = 0 : i64, tpu.core_type = #tpu.core_type<tc>, window_params = [{transform_indices = @transform_0, window_bounds = array<i64: 1, 8, 192>}, {pipeline_mode = #tpu.pipeline_mode<synchronous>, transform_indices = @transform_1, window_bounds = array<i64: 192, 256>}, {pipeline_mode = #tpu.pipeline_mode<synchronous>, transform_indices = @transform_2, window_bounds = array<i64: 256, 256>}, {pipeline_mode = #tpu.pipeline_mode<synchronous>, transform_indices = @transform_3, window_bounds = array<i64: 256, 128>}, {pipeline_mode = #tpu.pipeline_mode<synchronous>, transform_indices = @transform_4, window_bounds = array<i64: 128, 128>}, {pipeline_mode = #tpu.pipeline_mode<synchronous>, transform_indices = @transform_5, window_bounds = array<i64: 1, 128>}, {transform_indices = @transform_6, window_bounds = array<i64: 1, 8, 128>}]} {
    %c0 = arith.constant 0 : index
    %c0_0 = arith.constant 0 : index
    %c0_1 = arith.constant 0 : index
    %0 = vector.load %arg1[%c0, %c0_0, %c0_1] : memref<1x8x192xf32, #tpu.memory_space<vmem>>, vector<1x8x192xf32>
    %1 = vector.shape_cast %0 : vector<1x8x192xf32> to vector<8x192xf32>
    %2 = arith.truncf %1 : vector<8x192xf32> to vector<8x192xbf16>
    %c0_2 = arith.constant 0 : index
    %c0_3 = arith.constant 0 : index
    %3 = vector.load %arg2[%c0_2, %c0_3] : memref<192x256xbf16, #tpu.memory_space<vmem>>, vector<192x256xbf16>
    %cst = arith.constant dense<0.000000e+00> : vector<8x256xf32>
    %4 = tpu.matmul %2, %3, %cst {dimension_numbers = #tpu.dot_dimension_numbers<[1], [0], [0], [1], [0, 0, 1, 1], [], []>} : vector<8x192xbf16>, vector<192x256xbf16>, vector<8x256xf32> -> vector<8x256xf32>
    %5 = vector.extract_strided_slice %4 {offsets = [0, 192], sizes = [8, 1], strides = [1, 1]} : vector<8x256xf32> to vector<8x1xf32>
    %6 = vector.shape_cast %5 : vector<8x1xf32> to vector<1x8x1xf32>
    %cst_4 = arith.constant dense<0.000000e+00> : vector<1xf32>
    %7 = vector.multi_reduction <add>, %6, %cst_4 [1, 2] : vector<1x8x1xf32> to vector<1xf32>
    %8 = vector.shape_cast %7 : vector<1xf32> to vector<1x1x1xf32>
    %9 = vector.extract %8[0, 0, 0] : f32 from vector<1x1x1xf32>
    %cst_5 = arith.constant 1.536000e+03 : f32
    %10 = arith.divf %9, %cst_5 : f32
    %11 = arith.mulf %4, %4 : vector<8x256xf32>
    %12 = vector.shape_cast %11 : vector<8x256xf32> to vector<1x8x256xf32>
    %cst_6 = arith.constant dense<0.000000e+00> : vector<1xf32>
    %13 = vector.multi_reduction <add>, %12, %cst_6 [1, 2] : vector<1x8x256xf32> to vector<1xf32>
    %14 = vector.shape_cast %13 : vector<1xf32> to vector<1x1x1xf32>
    %15 = vector.extract %14[0, 0, 0] : f32 from vector<1x1x1xf32>
    %16 = arith.mulf %5, %5 : vector<8x1xf32>
    %17 = vector.shape_cast %16 : vector<8x1xf32> to vector<1x8x1xf32>
    %cst_7 = arith.constant dense<0.000000e+00> : vector<1xf32>
    %18 = vector.multi_reduction <add>, %17, %cst_7 [1, 2] : vector<1x8x1xf32> to vector<1xf32>
    %19 = vector.shape_cast %18 : vector<1xf32> to vector<1x1x1xf32>
    %20 = vector.extract %19[0, 0, 0] : f32 from vector<1x1x1xf32>
    %21 = arith.subf %15, %20 : f32
    %cst_8 = arith.constant 1.536000e+03 : f32
    %22 = arith.divf %21, %cst_8 : f32
    %23 = arith.mulf %10, %10 : f32
    %24 = arith.subf %22, %23 : f32
    %25 = vector.broadcast %10 : f32 to vector<8x256xf32>
    %26 = arith.subf %4, %25 : vector<8x256xf32>
    %cst_9 = arith.constant 9.99999974E-6 : f32
    %27 = arith.addf %24, %cst_9 : f32
    %28 = math.rsqrt %27 : f32
    %29 = vector.broadcast %28 : f32 to vector<8x256xf32>
    %30 = arith.mulf %26, %29 : vector<8x256xf32>
    %cst_10 = arith.constant 0.00999999977 : f32
    %31 = vector.broadcast %cst_10 : f32 to vector<8x256xf32>
    %32 = arith.mulf %31, %30 : vector<8x256xf32>
    %33 = arith.maximumf %30, %32 : vector<8x256xf32>
    %34 = arith.truncf %33 : vector<8x256xf32> to vector<8x256xbf16>
    %c0_11 = arith.constant 0 : index
    %c0_12 = arith.constant 0 : index
    %35 = vector.load %arg3[%c0_11, %c0_12] : memref<256x256xbf16, #tpu.memory_space<vmem>>, vector<256x256xbf16>
    %cst_13 = arith.constant dense<0.000000e+00> : vector<8x256xf32>
    %36 = tpu.matmul %34, %35, %cst_13 {dimension_numbers = #tpu.dot_dimension_numbers<[1], [0], [0], [1], [0, 0, 1, 1], [], []>} : vector<8x256xbf16>, vector<256x256xbf16>, vector<8x256xf32> -> vector<8x256xf32>
    %37 = vector.extract_strided_slice %36 {offsets = [0, 192], sizes = [8, 1], strides = [1, 1]} : vector<8x256xf32> to vector<8x1xf32>
    %38 = vector.shape_cast %37 : vector<8x1xf32> to vector<1x8x1xf32>
    %cst_14 = arith.constant dense<0.000000e+00> : vector<1xf32>
    %39 = vector.multi_reduction <add>, %38, %cst_14 [1, 2] : vector<1x8x1xf32> to vector<1xf32>
    %40 = vector.shape_cast %39 : vector<1xf32> to vector<1x1x1xf32>
    %41 = vector.extract %40[0, 0, 0] : f32 from vector<1x1x1xf32>
    %cst_15 = arith.constant 1.536000e+03 : f32
    %42 = arith.divf %41, %cst_15 : f32
    %43 = arith.mulf %36, %36 : vector<8x256xf32>
    %44 = vector.shape_cast %43 : vector<8x256xf32> to vector<1x8x256xf32>
    %cst_16 = arith.constant dense<0.000000e+00> : vector<1xf32>
    %45 = vector.multi_reduction <add>, %44, %cst_16 [1, 2] : vector<1x8x256xf32> to vector<1xf32>
    %46 = vector.shape_cast %45 : vector<1xf32> to vector<1x1x1xf32>
    %47 = vector.extract %46[0, 0, 0] : f32 from vector<1x1x1xf32>
    %48 = arith.mulf %37, %37 : vector<8x1xf32>
    %49 = vector.shape_cast %48 : vector<8x1xf32> to vector<1x8x1xf32>
    %cst_17 = arith.constant dense<0.000000e+00> : vector<1xf32>
    %50 = vector.multi_reduction <add>, %49, %cst_17 [1, 2] : vector<1x8x1xf32> to vector<1xf32>
    %51 = vector.shape_cast %50 : vector<1xf32> to vector<1x1x1xf32>
    %52 = vector.extract %51[0, 0, 0] : f32 from vector<1x1x1xf32>
    %53 = arith.subf %47, %52 : f32
    %cst_18 = arith.constant 1.536000e+03 : f32
    %54 = arith.divf %53, %cst_18 : f32
    %55 = arith.mulf %42, %42 : f32
    %56 = arith.subf %54, %55 : f32
    %57 = vector.broadcast %42 : f32 to vector<8x256xf32>
    %58 = arith.subf %36, %57 : vector<8x256xf32>
    %cst_19 = arith.constant 9.99999974E-6 : f32
    %59 = arith.addf %56, %cst_19 : f32
    %60 = math.rsqrt %59 : f32
    %61 = vector.broadcast %60 : f32 to vector<8x256xf32>
    %62 = arith.mulf %58, %61 : vector<8x256xf32>
    %cst_20 = arith.constant 0.00999999977 : f32
    %63 = vector.broadcast %cst_20 : f32 to vector<8x256xf32>
    %64 = arith.mulf %63, %62 : vector<8x256xf32>
    %65 = arith.maximumf %62, %64 : vector<8x256xf32>
    %66 = arith.truncf %65 : vector<8x256xf32> to vector<8x256xbf16>
    %c0_21 = arith.constant 0 : index
    %c0_22 = arith.constant 0 : index
    %67 = vector.load %arg4[%c0_21, %c0_22] : memref<256x128xbf16, #tpu.memory_space<vmem>>, vector<256x128xbf16>
    %cst_23 = arith.constant dense<0.000000e+00> : vector<8x128xf32>
    %68 = tpu.matmul %66, %67, %cst_23 {dimension_numbers = #tpu.dot_dimension_numbers<[1], [0], [0], [1], [0, 0, 1, 1], [], []>} : vector<8x256xbf16>, vector<256x128xbf16>, vector<8x128xf32> -> vector<8x128xf32>
    %69 = vector.extract_strided_slice %68 {offsets = [0, 64], sizes = [8, 1], strides = [1, 1]} : vector<8x128xf32> to vector<8x1xf32>
    %70 = vector.shape_cast %69 : vector<8x1xf32> to vector<1x8x1xf32>
    %cst_24 = arith.constant dense<0.000000e+00> : vector<1xf32>
    %71 = vector.multi_reduction <add>, %70, %cst_24 [1, 2] : vector<1x8x1xf32> to vector<1xf32>
    %72 = vector.shape_cast %71 : vector<1xf32> to vector<1x1x1xf32>
    %73 = vector.extract %72[0, 0, 0] : f32 from vector<1x1x1xf32>
    %cst_25 = arith.constant 5.120000e+02 : f32
    %74 = arith.divf %73, %cst_25 : f32
    %75 = arith.mulf %68, %68 : vector<8x128xf32>
    %76 = vector.shape_cast %75 : vector<8x128xf32> to vector<1x8x128xf32>
    %cst_26 = arith.constant dense<0.000000e+00> : vector<1xf32>
    %77 = vector.multi_reduction <add>, %76, %cst_26 [1, 2] : vector<1x8x128xf32> to vector<1xf32>
    %78 = vector.shape_cast %77 : vector<1xf32> to vector<1x1x1xf32>
    %79 = vector.extract %78[0, 0, 0] : f32 from vector<1x1x1xf32>
    %80 = arith.mulf %69, %69 : vector<8x1xf32>
    %81 = vector.shape_cast %80 : vector<8x1xf32> to vector<1x8x1xf32>
    %cst_27 = arith.constant dense<0.000000e+00> : vector<1xf32>
    %82 = vector.multi_reduction <add>, %81, %cst_27 [1, 2] : vector<1x8x1xf32> to vector<1xf32>
    %83 = vector.shape_cast %82 : vector<1xf32> to vector<1x1x1xf32>
    %84 = vector.extract %83[0, 0, 0] : f32 from vector<1x1x1xf32>
    %85 = arith.subf %79, %84 : f32
    %cst_28 = arith.constant 5.120000e+02 : f32
    %86 = arith.divf %85, %cst_28 : f32
    %87 = arith.mulf %74, %74 : f32
    %88 = arith.subf %86, %87 : f32
    %89 = vector.broadcast %74 : f32 to vector<8x128xf32>
    %90 = arith.subf %68, %89 : vector<8x128xf32>
    %cst_29 = arith.constant 9.99999974E-6 : f32
    %91 = arith.addf %88, %cst_29 : f32
    %92 = math.rsqrt %91 : f32
    %93 = vector.broadcast %92 : f32 to vector<8x128xf32>
    %94 = arith.mulf %90, %93 : vector<8x128xf32>
    %cst_30 = arith.constant 0.00999999977 : f32
    %95 = vector.broadcast %cst_30 : f32 to vector<8x128xf32>
    %96 = arith.mulf %95, %94 : vector<8x128xf32>
    %97 = arith.maximumf %94, %96 : vector<8x128xf32>
    %98 = arith.truncf %97 : vector<8x128xf32> to vector<8x128xbf16>
    %c0_31 = arith.constant 0 : index
    %c0_32 = arith.constant 0 : index
    %99 = vector.load %arg5[%c0_31, %c0_32] : memref<128x128xbf16, #tpu.memory_space<vmem>>, vector<128x128xbf16>
    %cst_33 = arith.constant dense<0.000000e+00> : vector<8x128xf32>
    %100 = tpu.matmul %98, %99, %cst_33 {dimension_numbers = #tpu.dot_dimension_numbers<[1], [0], [0], [1], [0, 0, 1, 1], [], []>} : vector<8x128xbf16>, vector<128x128xbf16>, vector<8x128xf32> -> vector<8x128xf32>
    %c0_34 = arith.constant 0 : index
    %c0_35 = arith.constant 0 : index
    %101 = vector.load %arg6[%c0_34, %c0_35] : memref<1x128xf32, #tpu.memory_space<vmem>>, vector<1x128xf32>
    %102 = vector.broadcast %101 : vector<1x128xf32> to vector<8x128xf32>
    %103 = arith.addf %100, %102 : vector<8x128xf32>
    %c0_36 = arith.constant 0 : index
    %c0_37 = arith.constant 0 : index
    %c0_38 = arith.constant 0 : index
    %104 = vector.load %arg7[%c0_36, %c0_37, %c0_38] : memref<1x8x128xf32, #tpu.memory_space<vmem>>, vector<1x8x128xf32>
    %105 = vector.shape_cast %104 : vector<1x8x128xf32> to vector<8x128xf32>
    %106 = vector.shape_cast %103 : vector<8x128xf32> to vector<1x8x128xf32>
    tpu.vector_store %arg7[%c0_36, %c0_37, %c0_38], %106 {strides = array<i32>} : memref<1x8x128xf32, #tpu.memory_space<vmem>>, vector<1x8x128xf32>,
    return
  }
  func.func @transform_0(%arg0: i32) -> (i32, i32, i32) {
    %c0_i32 = arith.constant 0 : i32
    %c0_i32_0 = arith.constant 0 : i32
    %c0_i32_1 = arith.constant 0 : i32
    return %arg0, %c0_i32, %c0_i32_0 : i32, i32, i32
  }
  func.func @transform_1(%arg0: i32) -> (i32, i32) {
    %c0_i32 = arith.constant 0 : i32
    %c0_i32_0 = arith.constant 0 : i32
    %c0_i32_1 = arith.constant 0 : i32
    return %c0_i32, %c0_i32_0 : i32, i32
  }
  func.func @transform_2(%arg0: i32) -> (i32, i32) {
    %c0_i32 = arith.constant 0 : i32
    %c0_i32_0 = arith.constant 0 : i32
    %c0_i32_1 = arith.constant 0 : i32
    return %c0_i32, %c0_i32_0 : i32, i32
  }
  func.func @transform_3(%arg0: i32) -> (i32, i32) {
    %c0_i32 = arith.constant 0 : i32
    %c0_i32_0 = arith.constant 0 : i32
    %c0_i32_1 = arith.constant 0 : i32
    return %c0_i32, %c0_i32_0 : i32, i32
  }
  func.func @transform_4(%arg0: i32) -> (i32, i32) {
    %c0_i32 = arith.constant 0 : i32
    %c0_i32_0 = arith.constant 0 : i32
    %c0_i32_1 = arith.constant 0 : i32
    return %c0_i32, %c0_i32_0 : i32, i32
  }
  func.func @transform_5(%arg0: i32) -> (i32, i32) {
    %c0_i32 = arith.constant 0 : i32
    %c0_i32_0 = arith.constant 0 : i32
    %c0_i32_1 = arith.constant 0 : i32
    return %c0_i32, %c0_i32_0 : i32, i32
  }
  func.func @transform_6(%arg0: i32) -> (i32, i32, i32) {
    %c0_i32 = arith.constant 0 : i32
    %c0_i32_0 = arith.constant 0 : i32
    %c0_i32_1 = arith.constant 0 : i32
    return %arg0, %c0_i32, %c0_i32_0 : i32, i32, i32
  }
}

</mosaic_0001>

<bundles_post_ra>
// kernel: tpu_custom_call.1
= control target key start
LH: loop header
LB: loop body
LE: loop exit
PB: predicated region body
PF: predicated region fallthrough
CT: control target
= control target key end

     0   :  { %11 = vsyncpa [#allocation3], 0  ;;  %s2331_s0 = inlined_call_operand.hbm [shape: f32[3,8,192], index: 0, kind: input, shape index: {}]   ;;  %s2332_s1 = inlined_call_operand.hbm [shape: bf16[192,256], index: 1, kind: input, shape index: {}]   ;;  %s2333_s2 = inlined_call_operand.hbm [shape: bf16[256,256], index: 2, kind: input, shape index: {}]   ;;  %s2334_s3 = inlined_call_operand.hbm [shape: bf16[256,128], index: 3, kind: input, shape index: {}]   ;;  %s2335_s4 = inlined_call_operand.hbm [shape: bf16[128,128], index: 4, kind: input, shape index: {}]   ;;  %s2336_s5 = inlined_call_operand.vmem [shape: f32[1,128], index: 5, kind: input, shape index: {}]   ;;  %s2337_s6 = inlined_call_operand.hbm [shape: f32[3,8,128], index: 6, kind: output, shape index: {}]  }
   0x1   :  { %13 = vsyncpa [#allocation3 + $0x1], 0 }
   0x2   :  { %14 = vsyncpa [#allocation6], 0 }
   0x3   :  { %15 = vsyncpa [#allocation9], 0 }
   0x4   :  { %16 = vsyncpa [#allocation4], 0 }
   0x5   :  { %18 = vsyncpa [#allocation4 + $0x1], 0  ;;  %s1997_s21 = smov 0   ;;  %s1999_s22 = smov 0  }
   0x6   :  { %s2001_s23 = smov 0   ;;  %s2003_s24 = smov 0  }
   0x7 LB: > { %s1949_s25 = smov [#allocation5]   ;;  %s2018_s27 = sadd.s32 4294967295, %s1947_s24   ;;  %s1947_s24 = sphi %s2003_s24, %s2360_s24   ;;  %s1943_s23 = sphi %s2001_s23, %s2359_s23   ;;  %s1939_s22 = sphi %s1999_s22, %s2358_s22   ;;  %s1935_s21 = sphi %s1997_s21, %s2357_s21  }
   0x8   : > { %s198_s26 = sshll.u32 %s1949_s25, 4  ;;  %p1345_p0 = scmp.ge.s32.totalorder %s1947_s24, 1  ;;  %s2023_s26 = int_to_ptr.vmem [resolvable:$true] %s198_s26 }
   0x9   : > { %p2338_p1 = scmp.eq.s32.totalorder %s2018_s27, 0  ;;  %p186_p2 = scmp.lt.s32.totalorder %s1947_s24, 4 }
   0xa   : > { %s1950_s29 = smov [#allocation8]   ;;  %s1951_s8 = smov [#allocation7]  }
   0xb   : > { %p2025_p3 = pnand %p1345_p0, %p186_p2  ;;  %s224_s30 = sshll.u32 %s1950_s29, 4  ;;  %s2037_s30 = int_to_ptr.vmem [resolvable:$true] %s224_s30 }
   0xc   : > { %s2039_s9 = sshll.u32 %s1951_s8, 4  ;;  %s1731_s12 = scalar_lea.hbm %s2332_s1, 3072  ;;  %s212_s9 = int_to_ptr.vmem [resolvable:$true] %s2039_s9 }
   0xd   : > { %s2341_s28 = scalar_select %p2025_p3, 1, 0 }
   0xe   : > { %p1543_p4 = pneg %p2025_p3  ;;  %p1732_p6 = scmp.ne.s32.totalorder %s2332_s1, %s1731_s12 }
   0xf   : > { %p1738_p10 = scmp.lt.u32.totalorder %s1731_s12, %s2332_s1 }
  0x10   : > { %p2033_p5 = pnand %p1543_p4, %p2338_p1 }
  0x12   : > { %p2049_p7 = pneg %p2033_p5 }
  0x14   : > { %p1734_p8 = pnand %p2049_p7, %p1732_p6 }
  0x16   : > { %p1735_p9 = pneg %p1734_p8 }
  0x18   : > { %p1740_p11 = pnand %p1738_p10, %p1735_p9 }
  0x1a   : > { %1743 = shalt.err (!%p1740_p11)
}
  0x1b   : > { %s1744_s18 = scalar_lea.vmem %s2023_s26, 3072  ;;  %p1752_p2 = scmp.lt.s32.totalorder %s2023_s26, %s2023_s26 }
  0x1c   : > { %p1745_p12 = scmp.ne.s32.totalorder %s2023_s26, %s1744_s18  ;;  %p1753_p4 = scmp.lt.s32.totalorder %s1744_s18, %s1744_s18 }
  0x1e   : > { %p1747_p13 = pnand %p1745_p12, %p2049_p7  ;;  %p1754_p6 = por %p1753_p4, %p1752_p2 }
  0x20   : > { %p1748_p0 = pneg %p1747_p13 }
  0x22   : > { %p1755_p8 = pnand %p1754_p6, %p1748_p0 }
  0x24   : > { %1758 = shalt.err (!%p1755_p8)
}
  0x25   : > { %s1952_s19 = smov 128   ;;  %s1953_s20 = smov 8  }
  0x26   : > { %1546 = dma.hbm_to_vmem [thread:$0]  (!%p2033_p5), %s2332_s1, 3072, %s2023_s26, [#allocation6], %s1952_s19, %s1952_s19, %s1953_s20  }
  0x27   : > { %s1759_s11 = scalar_lea.hbm %s2334_s3, 2048 }
  0x28   : > { %p1760_p9 = scmp.ne.s32.totalorder %s2334_s3, %s1759_s11  ;;  %p1766_p12 = scmp.lt.u32.totalorder %s1759_s11, %s2334_s3 }
  0x2a   : > { %p1762_p10 = pnand %p1760_p9, %p2049_p7 }
  0x2c   : > { %p1763_p11 = pneg %p1762_p10 }
  0x2e   : > { %p1768_p13 = pnand %p1766_p12, %p1763_p11 }
  0x30   : > { %1771 = shalt.err (!%p1768_p13)
}
  0x31   : > { %s1772_s26 = scalar_lea.vmem %s2037_s30, 2048  ;;  %p1780_p6 = scmp.lt.s32.totalorder %s2037_s30, %s2037_s30 }
  0x32   : > { %p1773_p0 = scmp.ne.s32.totalorder %s2037_s30, %s1772_s26  ;;  %p1781_p8 = scmp.lt.s32.totalorder %s1772_s26, %s1772_s26 }
  0x34   : > { %p1775_p2 = pnand %p1773_p0, %p2049_p7  ;;  %p1782_p9 = por %p1781_p8, %p1780_p6 }
  0x36   : > { %p1776_p4 = pneg %p1775_p2 }
  0x38   : > { %p1783_p10 = pnand %p1782_p9, %p1776_p4 }
  0x3a   : > { %1786 = shalt.err (!%p1783_p10)
}
  0x3b   : > { %s1954_s17 = smov 64   ;;  %s1955_s18 = smov 4  }
  0x3c   : > { %1552 = dma.hbm_to_vmem [thread:$0]  (!%p2033_p5), %s2334_s3, 2048, %s2037_s30, [#allocation9], %s1954_s17, %s1954_s17, %s1955_s18  }
  0x3d   : > { %s1787_s11 = scalar_lea.hbm %s2333_s2, 4096 }
  0x3e   : > { %p1788_p11 = scmp.ne.s32.totalorder %s2333_s2, %s1787_s11  ;;  %p1794_p0 = scmp.lt.u32.totalorder %s1787_s11, %s2333_s2 }
  0x40   : > { %p1790_p12 = pnand %p1788_p11, %p2049_p7 }
  0x42   : > { %p1791_p13 = pneg %p1790_p12 }
  0x44   : > { %p1796_p2 = pnand %p1794_p0, %p1791_p13 }
  0x46   : > { %1799 = shalt.err (!%p1796_p2)
}
  0x47   : > { %s1800_s26 = scalar_lea.vmem %s212_s9, 4096  ;;  %p1808_p9 = scmp.lt.s32.totalorder %s212_s9, %s212_s9 }
  0x48   : > { %p1801_p4 = scmp.ne.s32.totalorder %s212_s9, %s1800_s26  ;;  %p1809_p10 = scmp.lt.s32.totalorder %s1800_s26, %s1800_s26 }
  0x4a   : > { %p1803_p6 = pnand %p1801_p4, %p2049_p7  ;;  %p1810_p1 = por %p1809_p10, %p1808_p9 }
  0x4c   : > { %p1804_p8 = pneg %p1803_p6 }
  0x4e   : > { %p1811_p3 = pnand %p1810_p1, %p1804_p8 }
  0x50   : > { %1814 = shalt.err (!%p1811_p3)
}
  0x51   : > { %1549 = dma.hbm_to_vmem [thread:$0]  (!%p2033_p5), %s2333_s2, 4096, %s212_s9, [#allocation6], %s1952_s19, %s1952_s19, %s1953_s20  }
  0x52   : > { %s1956_s29 = smov [#allocation10]   ;;  %s1815_s12 = scalar_lea.hbm %s2335_s4, 1024 }
  0x53   : > { %s237_s8 = sshll.u32 %s1956_s29, 4  ;;  %p1816_p1 = scmp.ne.s32.totalorder %s2335_s4, %s1815_s12  ;;  %s238_s8 = int_to_ptr.vmem [resolvable:$true] %s237_s8 }
  0x54   : > { %p1822_p12 = scmp.lt.u32.totalorder %s1815_s12, %s2335_s4 }
  0x55   : > { %p1818_p3 = pnand %p1816_p1, %p2049_p7 }
  0x57   : > { %p1819_p11 = pneg %p1818_p3 }
  0x59   : > { %p1824_p13 = pnand %p1822_p12, %p1819_p11 }
  0x5b   : > { %1827 = shalt.err (!%p1824_p13)
}
  0x5c   : > { %s1828_s9 = scalar_lea.vmem %s238_s8, 1024  ;;  %p1836_p6 = scmp.lt.s32.totalorder %s238_s8, %s238_s8 }
  0x5d   : > { %p1829_p0 = scmp.ne.s32.totalorder %s238_s8, %s1828_s9  ;;  %p1837_p8 = scmp.lt.s32.totalorder %s1828_s9, %s1828_s9 }
  0x5f   : > { %p1831_p2 = pnand %p1829_p0, %p2049_p7  ;;  %p1838_p9 = por %p1837_p8, %p1836_p6 }
  0x61   : > { %p1832_p4 = pneg %p1831_p2 }
  0x63   : > { %p1839_p10 = pnand %p1838_p9, %p1832_p4 }
  0x65   : > { %1842 = shalt.err (!%p1839_p10)
}
  0x66   : > { %1555 = dma.hbm_to_vmem [thread:$0]  (!%p2033_p5), %s2335_s4, 1024, %s238_s8, [#allocation9], %s1954_s17, %s1954_s17, %s1955_s18  }
  0x67   : > { %s1344_s7 = sadd.s32 4294967294, %s1947_s24   ;;  %s2144_s15 = sadd.s32 1, %s1947_s24  }
  0x68   : > { %s28_s30 = ssub.s32 %s1947_s24, %s2144_s15  ;;  %s31_s25 = sadd.s32 1, %s1943_s23 }
  0x69   : > { %p29_p7 = scmp.eq.s32.totalorder %s28_s30, 0  ;;  %p38_p1 = scmp.ne.s32.totalorder %s1943_s23, %s1939_s22 }
  0x6a   : > { %p39_p3 = scmp.eq.s32.totalorder %s1947_s24, 0  ;;  %p44_p11 = scmp.ne.s32.totalorder %s1939_s22, %s1935_s21 }
  0x6b   : > { %s2155_s29 = scalar_select %p29_p7, %s1943_s23, %s31_s25  }
  0x6c   : > { %p2157_p12 = por %p39_p3, %p38_p1  ;;  %p2345_p13 = scmp.eq.s32.totalorder %s2018_s27, 0 }
  0x6d   : > { %p173_p0 = scmp.eq.s32.totalorder %s2018_s27, 2  ;;  %p179_p2 = scmp.eq.s32.totalorder %s1344_s7, 2 }
  0x6e   : > { %p2163_p5 = por %p2345_p13, %p44_p11  ;;  %p1568_p4 = scmp.lt.s32.totalorder %s1947_s24, 3 }
  0x6f   : > { %s254_s18 = sand.u32 1, %s1943_s23   ;;  %p2170_p6 = por %p173_p0, %p38_p1 }
  0x70   : > { %p2174_p8 = por %p179_p2, %p44_p11  ;;  %s1351_s12 = sshll.u32 %s254_s18, 4 }
  0x71   : > { %s2347_s8 = scalar_select %p2170_p6, 1, 0 }
  0x72   : > { %s2348_s11 = scalar_select %p2174_p8, 1, 0 }
  0x73   : > { %s1447_s13 = sshll.u32 %s1947_s24, 8  ;;  %s258_s9 = scalar_lea.vmem [#allocation2], %s1351_s12 }
  0x74   : > { %s2182_s26 = scalar_lea.hbm %s2331_s0, %s1447_s13  ;;  %s266_s19 = sshll.u32 %s258_s9, 4  ;;  %s2184_s19 = int_to_ptr.vmem [resolvable:$true] %s266_s19 }
  0x75   : > { %p2188_p9 = pnand %p1568_p4, %p2157_p12  ;;  %s255_s7 = scalar_lea.sflag [#allocation3], %s254_s18 }
  0x76   : > { %s1843_s30 = scalar_lea.hbm %s2182_s26, 256  ;;  %s1848_s13 = scalar_lea.hbm %s2331_s0, 768 }
  0x77   : > { %p1844_p10 = scmp.ne.s32.totalorder %s2182_s26, %s1843_s30  ;;  %p1845_p7 = pneg %p2188_p9 }
  0x78   : > { %p1849_p11 = scmp.lt.u32.totalorder %s2182_s26, %s2331_s0  ;;  %p1850_p12 = scmp.lt.u32.totalorder %s1848_s13, %s1843_s30 }
  0x79   : > { %p1846_p1 = pnand %p1845_p7, %p1844_p10  ;;  %p1852_p0 = scmp.lt.u32.totalorder %s1843_s30, %s2182_s26 }
  0x7a   : > { %p1851_p13 = por %p1850_p12, %p1849_p11 }
  0x7b   : > { %p1847_p3 = pneg %p1846_p1 }
  0x7c   : > { %p1853_p2 = por %p1852_p0, %p1851_p13 }
  0x7e   : > { %p1854_p4 = pnand %p1853_p2, %p1847_p3 }
  0x80   : > { %1857 = shalt.err (!%p1854_p4)
}
  0x81   : > { %s1858_s18 = scalar_lea.vmem %s2184_s19, 256  ;;  %s1957_s16 = smov [#allocation2]  }
  0x82   : > { %p1859_p10 = scmp.ne.s32.totalorder %s2184_s19, %s1858_s18  ;;  %s1863_s9 = sshll.u32 %s1957_s16, 4  ;;  %s1864_s9 = int_to_ptr.vmem [resolvable:$false] %s1863_s9 }
  0x83   : > { %s1865_s25 = scalar_lea.vmem %s1864_s9, 512  ;;  %p1866_p6 = scmp.lt.s32.totalorder %s2184_s19, %s1864_s9 }
  0x84   : > { %p1861_p1 = pnand %p1859_p10, %p1845_p7  ;;  %p1867_p11 = scmp.lt.s32.totalorder %s1865_s25, %s1858_s18 }
  0x86   : > { %p1862_p8 = pneg %p1861_p1  ;;  %p1868_p12 = por %p1867_p11, %p1866_p6 }
  0x88   : > { %p1869_p13 = pnand %p1868_p12, %p1862_p8 }
  0x8a   : > { %1872 = shalt.err (!%p1869_p13)
}
  0x8b   : > { %1559 = dma.hbm_to_vmem [thread:$0]  (!%p2188_p9), %s2182_s26, 256, %s2184_s19, %s255_s7  }
  0x8c   : > { %p2350_p3 = scmp.ne.s32.totalorder %s2341_s28, 0 }
  0x8d   : > { %s2220_s30 = sand.u32 (!%p2350_p3), 1, %s1939_s22  }
  0x8e   : > { %275 = sbr.rel (%p2350_p3) target bundleno = 2286 (0x8ee), region = 44  ;;  %s1355_s12 = sshll.u32 (!%p2350_p3), %s2220_s30, 4 }
  0x8f   : > { %s278_s13 = scalar_lea.sflag (!%p2350_p3), [#allocation3], %s2220_s30  ;;  %s2224_s10 = scalar_lea.vmem (!%p2350_p3), [#allocation2], %s1355_s12 }
  0x95   : > { %1918 = dma.done.wait (%p2163_p5), %s278_s13, 256  }
  0x96   : > { %1920 = vsyncadd (%p2163_p5), %s278_s13, 4294967040  ;;  %p2351_p6 = scmp.eq.s32.totalorder %s2018_s27, 0 }
  0x98   : > { %1922 = dma.done.wait (%p2351_p6), [#allocation6], 7168   ;;  %p2352_p8 = pmov %p2351_p6 }
  0x99   : > { %p2353_p9 = pmov %p2351_p6 }
  0x9a   : > { %1924 = vsyncadd (%p2352_p8), [#allocation6], 4294960128 }
  0x9b   : > { %1926 = dma.done.wait (%p2353_p9), [#allocation9], 3072   ;;  %p2354_p7 = pmov %p2351_p6 }
  0x9c   : > { %v1617_v0 = vld [vmem:[#allocation5 + $0x4] ss:$8 sps:$4 sm:$0xff]   ;;  %v1619_v1 = vld [vmem:[#allocation5] ss:$8 sps:$4 sm:$0xff]   ;;  %v1620_v2 = vld [vmem:[#allocation5 + $0x14] ss:$8 sps:$4 sm:$0xff]  }
  0x9d   : > { %1928 = vsyncadd (%p2354_p7), [#allocation9], 4294964224  ;;  %479 = vmatprep.subr.bf16.mxu0 %v1617_v0  ;;  %v1622_v3 = vld [vmem:[#allocation5 + $0x10] ss:$8 sps:$4 sm:$0xff]   ;;  %v1623_v4 = vld [vmem:[#allocation5 + $0x24] ss:$8 sps:$4 sm:$0xff]  }
  0x9e   : > { %480 = vmatpush1.bf16.msra.mxu0 %v1619_v1  ;;  %v1625_v5 = vld [vmem:[#allocation5 + $0x20] ss:$8 sps:$4 sm:$0xff]   ;;  %v1626_v6 = vld [vmem:[#allocation5 + $0x34] ss:$8 sps:$4 sm:$0xff]   ;;  %v1628_v7 = vld [vmem:[#allocation5 + $0x30] ss:$8 sps:$4 sm:$0xff]  }
  0x9f   : > { %481 = vmatprep.subr.bf16.mxu0 %v1620_v2  ;;  %v1629_v8 = vld [vmem:[#allocation5 + $0x44] ss:$8 sps:$4 sm:$0xff]   ;;  %v1631_v9 = vld [vmem:[#allocation5 + $0x40] ss:$8 sps:$4 sm:$0xff]   ;;  %v1632_v10 = vld [vmem:[#allocation5 + $0x54] ss:$8 sps:$4 sm:$0xff]  }
  0xa0   : > { %v328_v11 = vld [vmem:[%s2224_s10 + $0x8] sm:$0xff]  ;;  %vm475_vm0 = vcmask 523264   ;;  %v327_v26 = vld [vmem:[%s2224_s10] sm:$0xff]  ;;  %s1958_s28 = smov 64   ;;  %vm524_vm1 = vcmask 7168   ;;  %vm1960_vm2 = vmmov 0  }
  0xa1   : > { %v1634_v12 = vld [vmem:[#allocation5 + $0x50] ss:$8 sps:$4 sm:$0xff]   ;;  %v330_v13 = vpack.c.bf16 %v328_v11, %v328_v11  ;;  %v1635_v14 = vld [vmem:[#allocation5 + $0x64] ss:$8 sps:$4 sm:$0xff]   ;;  %v1637_v15 = vld [vmem:[#allocation5 + $0x60] ss:$8 sps:$4 sm:$0xff]   ;;  %v329_v27 = vpack.c.bf16 %v327_v26, %v327_v26 }
  0xa2   : > { %482 = vmatpush1.bf16.msra.mxu0 %v1622_v3  ;;  %v1638_v16 = vld [vmem:[#allocation5 + $0x74] ss:$8 sps:$4 sm:$0xff]   ;;  %v1640_v17 = vld [vmem:[#allocation5 + $0x70] ss:$8 sps:$4 sm:$0xff]   ;;  %v1641_v18 = vld [vmem:[#allocation5 + $0x84] ss:$8 sps:$4 sm:$0xff]  }
  0xa3   : > { %483 = vmatprep.subr.bf16.mxu0 %v1623_v4  ;;  %1385 = vmatprep.mubr.msk.bf16.mxu0 %vm475_vm0, %v330_v13  ;;  %v1643_v19 = vld [vmem:[#allocation5 + $0x80] ss:$8 sps:$4 sm:$0xff]   ;;  %v1644_v20 = vld [vmem:[#allocation5 + $0x94] ss:$8 sps:$4 sm:$0xff]   ;;  %v1646_v21 = vld [vmem:[#allocation5 + $0x90] ss:$8 sps:$4 sm:$0xff]  }
  0xa4   : > { %v1647_v22 = vld [vmem:[#allocation5 + $0xa4] ss:$8 sps:$4 sm:$0xff]   ;;  %v1649_v23 = vld [vmem:[#allocation5 + $0xa0] ss:$8 sps:$4 sm:$0xff]   ;;  %v1650_v24 = vld [vmem:[#allocation5 + $0xb4] ss:$8 sps:$4 sm:$0xff]  }
  0xa5   : > { %v1652_v25 = vld [vmem:[#allocation5 + $0xb0] ss:$8 sps:$4 sm:$0xff]   ;;  %v1653_v39 = vld [vmem:[#allocation7 + $0x4] ss:$8 sps:$4 sm:$0xff]   ;;  %v1655_v40 = vld [vmem:[#allocation7] ss:$8 sps:$4 sm:$0xff]  }
  0xa6   : > { %484 = vmatpush1.bf16.msra.mxu0 %v1625_v5  ;;  %778 = vmatprep.subr.bf16.mxu1 %v1653_v39  ;;  %v1656_v41 = vld [vmem:[#allocation7 + $0x14] ss:$8 sps:$4 sm:$0xff]   ;;  %v1658_v42 = vld [vmem:[#allocation7 + $0x10] ss:$8 sps:$4 sm:$0xff]   ;;  %v1659_v43 = vld [vmem:[#allocation7 + $0x24] ss:$8 sps:$4 sm:$0xff]  }
  0xa7   : > { %485 = vmatprep.subr.bf16.mxu0 %v1626_v6  ;;  %779 = vmatpush1.bf16.msra.mxu1 %v1655_v40  ;;  %v1661_v44 = vld [vmem:[#allocation7 + $0x20] ss:$8 sps:$4 sm:$0xff]   ;;  %v1662_v45 = vld [vmem:[#allocation7 + $0x34] ss:$8 sps:$4 sm:$0xff]   ;;  %v1664_v46 = vld [vmem:[#allocation7 + $0x30] ss:$8 sps:$4 sm:$0xff]  }
  0xa8   : > { %780 = vmatprep.subr.bf16.mxu1 %v1656_v41  ;;  %v1665_v47 = vld [vmem:[#allocation7 + $0x44] ss:$8 sps:$4 sm:$0xff]   ;;  %v1667_v48 = vld [vmem:[#allocation7 + $0x40] ss:$8 sps:$4 sm:$0xff]   ;;  %v1668_v49 = vld [vmem:[#allocation7 + $0x54] ss:$8 sps:$4 sm:$0xff]  }
  0xa9   : > { %v1670_v50 = vld [vmem:[#allocation7 + $0x50] ss:$8 sps:$4 sm:$0xff]   ;;  %v1671_v51 = vld [vmem:[#allocation7 + $0x64] ss:$8 sps:$4 sm:$0xff]   ;;  %v1673_v52 = vld [vmem:[#allocation7 + $0x60] ss:$8 sps:$4 sm:$0xff]  }
  0xaa   : > { %486 = vmatpush1.bf16.msra.mxu0 %v1628_v7  ;;  %v1674_v53 = vld [vmem:[#allocation7 + $0x74] ss:$8 sps:$4 sm:$0xff]   ;;  %v1676_v54 = vld [vmem:[#allocation7 + $0x70] ss:$8 sps:$4 sm:$0xff]   ;;  %v1677_v55 = vld [vmem:[#allocation7 + $0x84] ss:$8 sps:$4 sm:$0xff]  }
  0xab   : > { %487 = vmatprep.subr.bf16.mxu0 %v1629_v8  ;;  %781 = vmatpush1.bf16.msra.mxu1 %v1658_v42  ;;  %v1679_v56 = vld [vmem:[#allocation7 + $0x80] ss:$8 sps:$4 sm:$0xff]   ;;  %v1680_v57 = vld [vmem:[#allocation7 + $0x94] ss:$8 sps:$4 sm:$0xff]   ;;  %v1682_v58 = vld [vmem:[#allocation7 + $0x90] ss:$8 sps:$4 sm:$0xff]  }
  0xac   : > { %782 = vmatprep.subr.bf16.mxu1 %v1659_v43  ;;  %v1683_v59 = vld [vmem:[#allocation7 + $0xa4] ss:$8 sps:$4 sm:$0xff]   ;;  %v1685_v60 = vld [vmem:[#allocation7 + $0xa0] ss:$8 sps:$4 sm:$0xff]   ;;  %v1686_v61 = vld [vmem:[#allocation7 + $0xb4] ss:$8 sps:$4 sm:$0xff]  }
  0xad   : > { %v1688_v62 = vld [vmem:[#allocation7 + $0xb0] ss:$8 sps:$4 sm:$0xff]   ;;  %v1689_v63 = vld [vmem:[#allocation7 + $0xc4] ss:$8 sps:$4 sm:$0xff]   ;;  %v1691_v2 = vld [vmem:[#allocation7 + $0xc0] ss:$8 sps:$4 sm:$0xff]  }
  0xae   : > { %488 = vmatpush1.bf16.msra.mxu0 %v1631_v9  ;;  %v1692_v3 = vld [vmem:[#allocation7 + $0xd4] ss:$8 sps:$4 sm:$0xff]   ;;  %v1694_v13 = vld [vmem:[#allocation7 + $0xd0] ss:$8 sps:$4 sm:$0xff]   ;;  %p2355_p0 = scmp.ne.s32.totalorder %s2347_s8, 0 }
  0xaf   : > { %489 = vmatprep.subr.bf16.mxu0 %v1632_v10  ;;  %783 = vmatpush1.bf16.msra.mxu1 %v1661_v44 }
  0xb0   : > { %784 = vmatprep.subr.bf16.mxu1 %v1662_v45 }
  0xb2   : > { %490 = vmatpush1.bf16.msra.mxu0 %v1634_v12 }
  0xb3   : > { %491 = vmatprep.subr.bf16.mxu0 %v1635_v14  ;;  %785 = vmatpush1.bf16.msra.mxu1 %v1664_v46 }
  0xb4   : > { %786 = vmatprep.subr.bf16.mxu1 %v1665_v47 }
  0xb6   : > { %492 = vmatpush1.bf16.msra.mxu0 %v1637_v15 }
  0xb7   : > { %493 = vmatprep.subr.bf16.mxu0 %v1638_v16  ;;  %787 = vmatpush1.bf16.msra.mxu1 %v1667_v48 }
  0xb8   : > { %788 = vmatprep.subr.bf16.mxu1 %v1668_v49 }
  0xba   : > { %494 = vmatpush1.bf16.msra.mxu0 %v1640_v17  ;;  %v1695_v17 = vld [vmem:[#allocation7 + $0xe4] ss:$8 sps:$4 sm:$0xff]  }
  0xbb   : > { %495 = vmatprep.subr.bf16.mxu0 %v1641_v18  ;;  %789 = vmatpush1.bf16.msra.mxu1 %v1670_v50 }
  0xbc   : > { %790 = vmatprep.subr.bf16.mxu1 %v1671_v51 }
  0xbe   : > { %496 = vmatpush1.bf16.msra.mxu0 %v1643_v19 }
  0xbf   : > { %497 = vmatprep.subr.bf16.mxu0 %v1644_v20  ;;  %791 = vmatpush1.bf16.msra.mxu1 %v1673_v52 }
  0xc0   : > { %792 = vmatprep.subr.bf16.mxu1 %v1674_v53  ;;  %v1701_v53 = vld [vmem:[#allocation8 + $0x40] sm:$0xff]  }
  0xc2   : > { %498 = vmatpush1.bf16.msra.mxu0 %v1646_v21  ;;  %v1697_v21 = vld [vmem:[#allocation7 + $0xe0] ss:$8 sps:$4 sm:$0xff]  }
  0xc3   : > { %499 = vmatprep.subr.bf16.mxu0 %v1647_v22  ;;  %793 = vmatpush1.bf16.msra.mxu1 %v1676_v54  ;;  %v1702_v54 = vld [vmem:[#allocation8] sm:$0xff]  }
  0xc4   : > { %794 = vmatprep.subr.bf16.mxu1 %v1677_v55  ;;  %v1703_v55 = vld [vmem:[#allocation8 + $0x48] sm:$0xff]  }
  0xc6   : > { %500 = vmatpush1.bf16.msra.mxu0 %v1649_v23 }
  0xc7   : > { %501 = vmatprep.subr.bf16.mxu0 %v1650_v24  ;;  %795 = vmatpush1.bf16.msra.mxu1 %v1679_v56  ;;  %v1698_v24 = vld [vmem:[#allocation7 + $0xf4] ss:$8 sps:$4 sm:$0xff]   ;;  %v1704_v56 = vld [vmem:[#allocation8 + $0x8] sm:$0xff]  }
  0xc8   : > { %796 = vmatprep.subr.bf16.mxu1 %v1680_v57  ;;  %v1705_v57 = vld [vmem:[#allocation8 + $0x50] sm:$0xff]  }
  0xca   : > { %502 = vmatpush1.bf16.msra.mxu0 %v1652_v25 }
  0xcb   : > { %797 = vmatpush1.bf16.msra.mxu1 %v1682_v58  ;;  %1448 = vmatprep.subr.bf16.mxu0 %v1701_v53  ;;  %v1706_v58 = vld [vmem:[#allocation8 + $0x10] sm:$0xff]  }
  0xcc   : > { %798 = vmatprep.subr.bf16.mxu1 %v1683_v59  ;;  %v1707_v59 = vld [vmem:[#allocation8 + $0x58] sm:$0xff]   ;;  %v1719_v53 = vld [vmem:[#allocation10 + $0x10] sm:$0xff]  }
  0xcd   : > { %512 = vmatmul.mubr.bf16.vlgmr.msra.gmra.mrb[0].mxu0 %v329_v27  ;;  %v1700_v27 = vld [vmem:[#allocation7 + $0xf0] ss:$8 sps:$4 sm:$0xff]  }
  0xce   : > { %1449 = vmatpush3.bf16.msra.mxu0 %v1702_v54  ;;  %v1720_v54 = vld [vmem:[#allocation10 + $0x18] sm:$0xff]  }
  0xcf   : > { %799 = vmatpush1.bf16.msra.mxu1 %v1685_v60  ;;  %1450 = vmatprep.subr.bf16.mxu0 %v1703_v55  ;;  %v1708_v60 = vld [vmem:[#allocation8 + $0x18] sm:$0xff]   ;;  %v1721_v55 = vld [vmem:[#allocation10 + $0x20] sm:$0xff]  }
  0xd0   : > { %800 = vmatprep.subr.bf16.mxu1 %v1686_v61  ;;  %v1709_v61 = vld [vmem:[#allocation8 + $0x60] sm:$0xff]  }
  0xd2   : > { %1451 = vmatpush3.bf16.msra.mxu0 %v1704_v56  ;;  %v1722_v56 = vld [vmem:[#allocation10 + $0x28] sm:$0xff]  }
  0xd3   : > { %801 = vmatpush1.bf16.msra.mxu1 %v1688_v62  ;;  %1452 = vmatprep.subr.bf16.mxu0 %v1705_v57  ;;  %v1710_v62 = vld [vmem:[#allocation8 + $0x20] sm:$0xff]  }
  0xd4   : > { %802 = vmatprep.subr.bf16.mxu1 %v1689_v63  ;;  %v1711_v63 = vld [vmem:[#allocation8 + $0x68] sm:$0xff]  }
  0xd6   : > { %1453 = vmatpush3.bf16.msra.mxu0 %v1706_v58 }
  0xd7   : > { %803 = vmatpush1.bf16.msra.mxu1 %v1691_v2  ;;  %1454 = vmatprep.subr.bf16.mxu0 %v1707_v59 }
  0xd8   : > { %804 = vmatprep.subr.bf16.mxu1 %v1692_v3 }
  0xda   : > { %1455 = vmatpush3.bf16.msra.mxu0 %v1708_v60 }
  0xdb   : > { %805 = vmatpush1.bf16.msra.mxu1 %v1694_v13  ;;  %1456 = vmatprep.subr.bf16.mxu0 %v1709_v61  ;;  %v1712_v13 = vld [vmem:[#allocation8 + $0x28] sm:$0xff]  }
  0xdc   : > { %806 = vmatprep.subr.bf16.mxu1 %v1695_v17  ;;  %v1713_v17 = vld [vmem:[#allocation8 + $0x70] sm:$0xff]  }
  0xde   : > { %1457 = vmatpush3.bf16.msra.mxu0 %v1710_v62 }
  0xdf   : > { %807 = vmatpush1.bf16.msra.mxu1 %v1697_v21  ;;  %1458 = vmatprep.subr.bf16.mxu0 %v1711_v63 }
  0xe0   : > { %808 = vmatprep.subr.bf16.mxu1 %v1698_v24 }
  0xe2   : > { %1459 = vmatpush3.bf16.msra.mxu0 %v1712_v13 }
  0xe3   : > { %809 = vmatpush1.bf16.msra.mxu1 %v1700_v27  ;;  %1460 = vmatprep.subr.bf16.mxu0 %v1713_v17 }
 0x1a0   : > { %v2240_v28 = vpop.f32.mrb[0].mxu0 }
 0x1a1   : > { %v538_v29 = vmul.f32 %v2240_v28, %v2240_v28  ;;  %v2244_v30 = vpop.f32.mrb[1].mxu0 }
 0x1a2   : > { %v539_v31 = vmul.f32 %v2244_v30, %v2244_v30  ;;  %521 = vrot.lane.b32.xlu0 %v2244_v30, %s1958_s28  ;;  %v517_v32 = vpop.f32.mrb[2].mxu0 }
 0x1a3   : > { %v518_v33 = vpop.f32.mrb[3].mxu0 }
 0x1a4   : > { %v540_v34 = vadd.f32 %v539_v31, %v538_v29 }
 0x1a6   : > { %551 = vrot.lane.b32.xlu0 %v539_v31, %s1958_s28 }
 0x214   : > { %v522_v35 = vpop.permute.xlu0 %521 }
 0x215   : > { %v525_v36 = vsel %vm524_vm1, %v522_v35, 0.0 }
 0x216   : > { %526 = vadd.xlane.f32.xlu1 %v525_v36 }
 0x218   : > { %v552_v37 = vpop.permute.xlu0 %551 }
 0x219   : > { %v554_v38 = vsel %vm524_vm1, %v552_v37, 0.0 }
 0x21a   : > { %555 = vadd.xlane.f32.xlu0 %v554_v38  ;;  %541 = vadd.xlane.f32.xlu1 %v540_v34 }
 0x2a3   : > { %v527_v0 = vpop.xlane.xlu1 %526 }
 0x2a4   : > { %v528_v1 = vrot.slane %v527_v0, 4 }
 0x2a6   : > { %v529_v4 = vadd.f32 %v528_v1, %v527_v0 }
 0x2a7   : > { %v556_v5 = vpop.xlane.xlu0 %555  ;;  %v542_v6 = vpop.xlane.xlu1 %541 }
 0x2a8   : > { %v530_v7 = vrot.slane %v529_v4, 2  ;;  %v557_v8 = vrot.slane %v556_v5, 4  ;;  %v543_v9 = vrot.slane %v542_v6, 4 }
 0x2aa   : > { %v558_v10 = vadd.f32 %v557_v8, %v556_v5  ;;  %v544_v11 = vadd.f32 %v543_v9, %v542_v6  ;;  %v531_v12 = vadd.f32 %v530_v7, %v529_v4 }
 0x2ac   : > { %v559_v14 = vrot.slane %v558_v10, 2  ;;  %v545_v15 = vrot.slane %v544_v11, 2  ;;  %v532_v16 = vrot.slane %v531_v12, 1 }
 0x2ae   : > { %v533_v18 = vadd.f32 %v532_v16, %v531_v12  ;;  %v546_v19 = vadd.f32 %v545_v15, %v544_v11  ;;  %v560_v20 = vadd.f32 %v559_v14, %v558_v10 }
 0x2b0   : > { %1499 = vpush %v533_v18  ;;  %v547_v22 = vrot.slane %v546_v19, 1  ;;  %v561_v23 = vrot.slane %v560_v20, 1 }
 0x2b2   : > { %v548_v25 = vadd.f32 %v547_v22, %v546_v19  ;;  %v562_v26 = vadd.f32 %v561_v23, %v560_v20  ;;  %v1714_v20 = vld [vmem:[#allocation8 + $0x30] sm:$0xff]   ;;  %v1715_v23 = vld [vmem:[#allocation8 + $0x78] sm:$0xff]  }
 0x2b3   : > { %1461 = vmatpush3.bf16.msra.mxu0 %v1714_v20 }
 0x2b4   : > { %1501 = vpush %v548_v25  ;;  %v1716_v25 = vld [vmem:[#allocation8 + $0x38] sm:$0xff]   ;;  %1462 = vmatprep.subr.bf16.mxu0 %v1715_v23 }
 0x2b5   : > { %1503 = vpush %v562_v26 }
 0x2b7   : > { %1463 = vmatpush3.bf16.msra.mxu0 %v1716_v25  ;;  %v1434_v25 = vld [vmem:[%s2336_s5] ss:$0 sm:$0xff] }
 0x2e1   : > { %s1500_s17 = spop %1499 }
 0x2e2   : > { %s537_s26 = smul.f32 0.0006510417, %s1500_s17 }
 0x2e4   : > { %v570_v29 = vstv %s537_s26  ;;  %s568_s14 = smul.f32 %s537_s26, %s537_s26 }
 0x2e5   : > { %s1502_s19 = spop %1501  ;;  %v571_v31 = vsub.f32 %v2240_v28, %v570_v29  ;;  %v572_v32 = vsub.f32 %v2244_v30, %v570_v29 }
 0x2e6   : > { %s1504_s20 = spop %1503 }
 0x2e7   : > { %s564_s7 = ssub.f32 %s1502_s19, %s1504_s20 }
 0x2e9   : > { %s567_s18 = smul.f32 0.0006510417, %s564_s7 }
 0x2eb   : > { %s569_s16 = ssub.f32 %s567_s18, %s568_s14 }
 0x2ed   : > { %s573_s9 = sadd.f32 1e-05, %s569_s16 }
 0x2ef   : > { %v574_v33 = vstv %s573_s9 }
 0x2f0   : > { %1725 = vrsqrt.f32 %v574_v33 }
 0x2fa   : > { %v1726_v34 = vpop.eup %1725 }
 0x2fb   : > { %1505 = vpush %v1726_v34 }
 0x32c   : > { %s1506_s25 = spop %1505 }
 0x32d   : > { %v577_v35 = vstv %s1506_s25 }
 0x32e   : > { %v578_v36 = vmul.f32 %v577_v35, %v571_v31  ;;  %v579_v37 = vmul.f32 %v577_v35, %v572_v32 }
 0x330   : > { %v580_v38 = vmul.f32 0.01, %v578_v36  ;;  %v581_v39 = vmul.f32 0.01, %v579_v37 }
 0x332   : > { %v582_v40 = vmax.f32 %v578_v36, %v580_v38  ;;  %v583_v28 = vmax.f32 %v579_v37, %v581_v39 }
 0x334   : > { %v585_v41 = vpack.c.bf16 %v583_v28, %v583_v28  ;;  %v584_v30 = vpack.c.bf16 %v582_v40, %v582_v40 }
 0x336   : > { %810 = vmatprep.mubr.bf16.mxu1 %v585_v41 }
 0x337   : > { %811 = vmatmul.mubr.bf16.vlgmr.msra.gmra.mrb[0].mxu1 %v584_v30 }
 0x40a   : > { %v2255_v42 = vpop.f32.mrb[0].mxu1 }
 0x40b   : > { %v836_v43 = vmul.f32 %v2255_v42, %v2255_v42  ;;  %v2259_v44 = vpop.f32.mrb[1].mxu1 }
 0x40c   : > { %v837_v45 = vmul.f32 %v2259_v44, %v2259_v44  ;;  %820 = vrot.lane.b32.xlu1 %v2259_v44, %s1958_s28  ;;  %v816_v46 = vpop.f32.mrb[2].mxu1 }
 0x40d   : > { %v817_v47 = vpop.f32.mrb[3].mxu1 }
 0x40e   : > { %v838_v48 = vadd.f32 %v837_v45, %v836_v43 }
 0x410   : > { %849 = vrot.lane.b32.xlu1 %v837_v45, %s1958_s28  ;;  %839 = vadd.xlane.f32.xlu0 %v838_v48 }
 0x47e   : > { %v821_v49 = vpop.permute.xlu1 %820 }
 0x47f   : > { %v823_v50 = vsel %vm524_vm1, %v821_v49, 0.0 }
 0x480   : > { %824 = vadd.xlane.f32.xlu1 %v823_v50  ;;  %v1717_v50 = vld [vmem:[#allocation10] sm:$0xff]  }
 0x482   : > { %v850_v51 = vpop.permute.xlu1 %849 }
 0x483   : > { %v852_v52 = vsel %vm524_vm1, %v850_v51, 0.0  ;;  %v1959_v51 = vmov 0.0  }
 0x484   : > { %853 = vadd.xlane.f32.xlu0 %v852_v52  ;;  %1479 = vmatprep.subr.bf16.mxu1 %v1959_v51  ;;  %v1718_v52 = vld [vmem:[#allocation10 + $0x8] sm:$0xff]  }
 0x485   : > { %1480 = vmatpush3.bf16.msra.mxu1 %v1717_v50  ;;  %1495 = vmatprep.mubr.msk.bf16.mxu1 %vm1960_vm2, %v1959_v51 }
 0x486   : > { %1481 = vmatprep.subr.bf16.mxu1 %v1959_v51 }
 0x489   : > { %1482 = vmatpush3.bf16.msra.mxu1 %v1718_v52 }
 0x48a   : > { %1483 = vmatprep.subr.bf16.mxu1 %v1959_v51 }
 0x48d   : > { %1484 = vmatpush3.bf16.msra.mxu1 %v1719_v53 }
 0x48e   : > { %1485 = vmatprep.subr.bf16.mxu1 %v1959_v51 }
 0x491   : > { %1486 = vmatpush3.bf16.msra.mxu1 %v1720_v54 }
 0x492   : > { %1487 = vmatprep.subr.bf16.mxu1 %v1959_v51 }
 0x495   : > { %1488 = vmatpush3.bf16.msra.mxu1 %v1721_v55 }
 0x496   : > { %1489 = vmatprep.subr.bf16.mxu1 %v1959_v51 }
 0x499   : > { %1490 = vmatpush3.bf16.msra.mxu1 %v1722_v56 }
 0x49a   : > { %1491 = vmatprep.subr.bf16.mxu1 %v1959_v51 }
 0x49d   : > { %v840_v0 = vpop.xlane.xlu0 %839 }
 0x49e   : > { %v841_v1 = vrot.slane %v840_v0, 4 }
 0x4a0   : > { %v842_v2 = vadd.f32 %v841_v1, %v840_v0 }
 0x4a2   : > { %v843_v3 = vrot.slane %v842_v2, 2 }
 0x4a4   : > { %v844_v8 = vadd.f32 %v843_v3, %v842_v2 }
 0x4a6   : > { %v845_v14 = vrot.slane %v844_v8, 1 }
 0x4a8   : > { %v846_v21 = vadd.f32 %v845_v14, %v844_v8  ;;  %v1724_v14 = vld [vmem:[#allocation10 + $0x38] sm:$0xff]  }
 0x50d   : > { %v825_v4 = vpop.xlane.xlu1 %824 }
 0x50e   : > { %v826_v5 = vrot.slane %v825_v4, 4 }
 0x510   : > { %v827_v6 = vadd.f32 %v826_v5, %v825_v4 }
 0x511   : > { %v854_v7 = vpop.xlane.xlu0 %853 }
 0x512   : > { %v828_v9 = vrot.slane %v827_v6, 2  ;;  %v855_v10 = vrot.slane %v854_v7, 4 }
 0x514   : > { %v856_v11 = vadd.f32 %v855_v10, %v854_v7  ;;  %v829_v12 = vadd.f32 %v828_v9, %v827_v6  ;;  %v1723_v9 = vld [vmem:[#allocation10 + $0x30] sm:$0xff]  }
 0x515   : > { %1492 = vmatpush3.bf16.msra.mxu1 %v1723_v9 }
 0x516   : > { %v857_v15 = vrot.slane %v856_v11, 2  ;;  %v830_v16 = vrot.slane %v829_v12, 1  ;;  %1493 = vmatprep.subr.bf16.mxu1 %v1959_v51 }
 0x518   : > { %v831_v18 = vadd.f32 %v830_v16, %v829_v12  ;;  %v858_v19 = vadd.f32 %v857_v15, %v856_v11 }
 0x519   : > { %1494 = vmatpush3.bf16.msra.mxu1 %v1724_v14 }
 0x51a   : > { %1507 = vpush %v831_v18  ;;  %v859_v22 = vrot.slane %v858_v19, 1 }
 0x51b   : > { %1509 = vpush %v846_v21 }
 0x51c   : > { %v860_v24 = vadd.f32 %v859_v22, %v858_v19 }
 0x51e   : > { %1511 = vpush %v860_v24 }
 0x54b   : > { %s1508_s12 = spop %1507 }
 0x54c   : > { %s835_s13 = smul.f32 0.0006510417, %s1508_s12  ;;  %s1510_s10 = spop %1509 }
 0x54e   : > { %v868_v26 = vstv %s835_s13  ;;  %s866_s19 = smul.f32 %s835_s13, %s835_s13 }
 0x54f   : > { %s1512_s17 = spop %1511  ;;  %v869_v27 = vsub.f32 %v2255_v42, %v868_v26  ;;  %v870_v29 = vsub.f32 %v2259_v44, %v868_v26 }
 0x550   : > { %s862_s26 = ssub.f32 %s1510_s10, %s1512_s17 }
 0x552   : > { %s865_s20 = smul.f32 0.0006510417, %s862_s26 }
 0x554   : > { %s867_s7 = ssub.f32 %s865_s20, %s866_s19  ;;  %s1360_s20 = sshll.u32 %s2220_s30, 3 }
 0x556   : > { %s871_s14 = sadd.f32 1e-05, %s867_s7 }
 0x558   : > { %v872_v31 = vstv %s871_s14 }
 0x559   : > { %1727 = vrsqrt.f32 %v872_v31 }
 0x563   : > { %v1728_v32 = vpop.eup %1727 }
 0x564   : > { %1513 = vpush %v1728_v32 }
 0x595   : > { %s1514_s18 = spop %1513 }
 0x596   : > { %v875_v33 = vstv %s1514_s18  ;;  %s1444_s18 = sshll.u32 %s2018_s27, 7 }
 0x597   : > { %v876_v34 = vmul.f32 %v875_v33, %v869_v27  ;;  %v877_v35 = vmul.f32 %v875_v33, %v870_v29 }
 0x599   : > { %v878_v36 = vmul.f32 0.01, %v876_v34  ;;  %v879_v37 = vmul.f32 0.01, %v877_v35 }
 0x59b   : > { %v880_v38 = vmax.f32 %v876_v34, %v878_v36  ;;  %v881_v39 = vmax.f32 %v877_v35, %v879_v37 }
 0x59d   : > { %v882_v40 = vpack.c.bf16 %v880_v38, %v880_v38  ;;  %v883_v28 = vpack.c.bf16 %v881_v39, %v881_v39 }
 0x59f   : > { %1044 = vmatprep.mubr.bf16.mxu0 %v883_v28 }
 0x5a0   : > { %1045 = vmatmul.mubr.bf16.vlgmr.msra.gmra.mrb[4].mxu0 %v882_v40 }
 0x673   : > { %v1464_v41 = vpop.f32.mrb[4].mxu0 }
 0x674   : > { %v1465_v30 = vpop.f32.mrb[5].mxu0 }
 0x675   : > { %v2270_v42 = vadd.f32 %v1465_v30, %v1464_v41  ;;  %v1467_v43 = vpop.f32.mrb[6].mxu0 }
 0x676   : > { %v1468_v44 = vpop.f32.mrb[7].mxu0 }
 0x677   : > { %1053 = vrot.lane.b32.xlu0 %v2270_v42, %s1958_s28  ;;  %v1069_v45 = vmul.f32 %v2270_v42, %v2270_v42 }
 0x679   : > { %1080 = vrot.lane.b32.xlu1 %v1069_v45, %s1958_s28 }
 0x69d   : > { %1070 = vadd.xlane.f32.xlu1 %v1069_v45 }
 0x6e9   : > { %v1054_v46 = vpop.permute.xlu0 %1053 }
 0x6ea   : > { %v1056_v47 = vsel %vm524_vm1, %v1054_v46, 0.0 }
 0x6eb   : > { %1057 = vadd.xlane.f32.xlu0 %v1056_v47  ;;  %v1081_v48 = vpop.permute.xlu1 %1080 }
 0x6ec   : > { %v1083_v49 = vsel %vm524_vm1, %v1081_v48, 0.0 }
 0x6ef   : > { %1084 = vadd.xlane.f32.xlu0 %v1083_v49 }
 0x72a   : > { %v1071_v57 = vpop.xlane.xlu1 %1070 }
 0x72b   : > { %v1072_v58 = vrot.slane %v1071_v57, 4 }
 0x72d   : > { %v1073_v59 = vadd.f32 %v1072_v58, %v1071_v57 }
 0x72f   : > { %v1074_v60 = vrot.slane %v1073_v59, 2 }
 0x731   : > { %v1075_v0 = vadd.f32 %v1074_v60, %v1073_v59 }
 0x733   : > { %v1076_v6 = vrot.slane %v1075_v0, 1 }
 0x735   : > { %v1077_v12 = vadd.f32 %v1076_v6, %v1075_v0 }
 0x778   : > { %v1058_v61 = vpop.xlane.xlu0 %1057 }
 0x779   : > { %v1059_v62 = vrot.slane %v1058_v61, 4 }
 0x77b   : > { %v1060_v63 = vadd.f32 %v1059_v62, %v1058_v61 }
 0x77c   : > { %v1085_v1 = vpop.xlane.xlu0 %1084 }
 0x77d   : > { %v1061_v2 = vrot.slane %v1060_v63, 2  ;;  %v1086_v3 = vrot.slane %v1085_v1, 4 }
 0x77f   : > { %v1087_v4 = vadd.f32 %v1086_v3, %v1085_v1  ;;  %v1062_v5 = vadd.f32 %v1061_v2, %v1060_v63 }
 0x781   : > { %v1088_v7 = vrot.slane %v1087_v4, 2  ;;  %v1063_v8 = vrot.slane %v1062_v5, 1 }
 0x783   : > { %v1089_v10 = vadd.f32 %v1088_v7, %v1087_v4  ;;  %v1064_v11 = vadd.f32 %v1063_v8, %v1062_v5 }
 0x785   : > { %1515 = vpush %v1064_v11  ;;  %v1090_v13 = vrot.slane %v1089_v10, 1 }
 0x786   : > { %1517 = vpush %v1077_v12 }
 0x787   : > { %v1091_v15 = vadd.f32 %v1090_v13, %v1089_v10 }
 0x789   : > { %1519 = vpush %v1091_v15 }
 0x7b6   : > { %s1516_s28 = spop %1515 }
 0x7b7   : > { %s1068_s16 = smul.f32 0.001953125, %s1516_s28  ;;  %s1518_s9 = spop %1517 }
 0x7b8   : > { %s325_s28 = scalar_lea.vmem [#allocation11], %s1360_s20 }
 0x7b9   : > { %s1097_s13 = smul.f32 %s1068_s16, %s1068_s16  ;;  %v1099_v18 = vstv %s1068_s16 }
 0x7ba   : > { %s1520_s25 = spop %1519  ;;  %v1100_v19 = vsub.f32 %v2270_v42, %v1099_v18 }
 0x7bb   : > { %s1093_s12 = ssub.f32 %s1518_s9, %s1520_s25  ;;  %s1236_s9 = sshll.u32 %s325_s28, 4  ;;  %s2290_s9 = int_to_ptr.vmem [resolvable:$true] %s1236_s9 }
 0x7bc   : > { %s1873_s27 = scalar_lea.vmem %s2290_s9, 128 }
 0x7bd   : > { %s1096_s10 = smul.f32 0.001953125, %s1093_s12  ;;  %s2288_s12 = scalar_lea.hbm %s2337_s6, %s1444_s18 }
 0x7be   : > { %p1874_p5 = scmp.ne.s32.totalorder %s2290_s9, %s1873_s27 }
 0x7bf   : > { %s1098_s17 = ssub.f32 %s1096_s10, %s1097_s13  ;;  %s1223_s13 = scalar_lea.sflag [#allocation4], %s2220_s30 }
 0x7c0   : > { %p1875_p2 = pnand %p1874_p5, %p2355_p0  ;;  %s1961_s10 = smov [#allocation11]  }
 0x7c1   : > { %s1101_s26 = sadd.f32 1e-05, %s1098_s17  ;;  %s1877_s17 = sshll.u32 %s1961_s10, 4  ;;  %s1878_s17 = int_to_ptr.vmem [resolvable:$false] %s1877_s17 }
 0x7c2   : > { %p1876_p4 = pneg %p1875_p2  ;;  %p1880_p10 = scmp.lt.s32.totalorder %s2290_s9, %s1878_s17 }
 0x7c3   : > { %v1102_v16 = vstv %s1101_s26  ;;  %s1879_s26 = scalar_lea.vmem %s1878_s17, 256 }
 0x7c4   : > { %1729 = vrsqrt.f32 %v1102_v16  ;;  %p1881_p1 = scmp.lt.s32.totalorder %s1879_s26, %s1873_s27 }
 0x7c6   : > { %p1882_p11 = por %p1881_p1, %p1880_p10 }
 0x7c8   : > { %p1883_p12 = pnand %p1882_p11, %p1876_p4 }
 0x7ce   : > { %v1730_v17 = vpop.eup %1729 }
 0x7cf   : > { %1521 = vpush %v1730_v17 }
 0x800   : > { %s1522_s19 = spop %1521 }
 0x801   : > { %v1105_v20 = vstv %s1522_s19 }
 0x802   : > { %v1106_v21 = vmul.f32 %v1105_v20, %v1100_v19 }
 0x804   : > { %v1107_v22 = vmul.f32 0.01, %v1106_v21 }
 0x806   : > { %v1108_v23 = vmax.f32 %v1106_v21, %v1107_v22 }
 0x808   : > { %v1109_v24 = vpack.c.bf16 %v1108_v23, %v1108_v23 }
 0x80a   : > { %1496 = vmatmul.mubr.bf16.vlgmr.msra.gmra.mrb[4].mxu1 %v1109_v24 }
 0x8dd   : > { %v1215_v26 = vpop.f32.mrb[4].mxu1 }
 0x8de   : > { %v1216_v27 = vadd.f32 %v1434_v25, %v1215_v26  ;;  %v1497_v29 = vpop.f32.mrb[5].mxu1 }
 0x8df   : > { %v1218_v31 = vpop.f32.mrb[6].mxu1 }
 0x8e0   : > { %1221 = vst [vmem:[%s325_s28] sm:$0xff] %v1216_v27  ;;  %v1498_v32 = vpop.f32.mrb[7].mxu1 }
 0x8e1   : > { %1886 = shalt.err (!%p1883_p12)
}
 0x8e2   : > { %s1887_s30 = scalar_lea.hbm %s2288_s12, 128  ;;  %s1891_s7 = scalar_lea.hbm %s2337_s6, 384 }
 0x8e3   : > { %p1888_p13 = scmp.ne.s32.totalorder %s2288_s12, %s1887_s30  ;;  %p1892_p8 = scmp.lt.u32.totalorder %s2288_s12, %s2337_s6 }
 0x8e4   : > { %p1893_p9 = scmp.lt.u32.totalorder %s1891_s7, %s1887_s30  ;;  %p1895_p5 = scmp.lt.u32.totalorder %s1887_s30, %s2288_s12 }
 0x8e5   : > { %p1889_p3 = pnand %p1888_p13, %p2355_p0 }
 0x8e6   : > { %p1894_p7 = por %p1893_p9, %p1892_p8 }
 0x8e7   : > { %p1890_p6 = pneg %p1889_p3 }
 0x8e8   : > { %p1896_p2 = por %p1895_p5, %p1894_p7 }
 0x8ea   : > { %p1897_p4 = pnand %p1896_p2, %p1890_p6 }
 0x8ec   : > { %1900 = shalt.err (!%p1897_p4)
}
 0x8ed   : > { %1541 = dma.vmem_to_hbm [thread:$0]  (%p2355_p0), %s2290_s9, 128, %s2288_s12, %s1223_s13  }
 0x8ee PF: > { %p1573_p10 = scmp.ge.s32.totalorder %s1947_s24, 2  ;;  %s1248_s28 = sand.u32 1, %s1935_s21  }
 0x8ef   : > { %p2356_p1 = scmp.ne.s32.totalorder %s2348_s11, 0  ;;  %s1249_s16 = scalar_lea.sflag [#allocation4], %s1248_s28 }
 0x8f1   : > { %p1561_p11 = pnand %p1573_p10, %p2356_p1 }
 0x8f3   : > { %1930 = dma.done.wait (!%p1561_p11), %s1249_s16, 128  }
 0x8f4   : > { %1932 = vsyncadd (!%p1561_p11), %s1249_s16, 4294967168  ;;  %p21_p12 = scmp.ge.s32.totalorder %s2144_s15, 5   ;;  %s2357_s21 = smov %s1939_s22 }
 0x8f5   : > { %s2358_s22 = smov %s1943_s23  ;;  %s2359_s23 = smov %s2155_s29 }
 0x8f6   : > { %s2360_s24 = smov %s2144_s15  ;;  %23 = sbr.rel (!%p21_p12) target bundleno = 7 (0x7), region = 105 }
 0x8fd   :  { %1254 = vsyncpa [#allocation3], 1 }
 0x8fe   :  { %1256 = vsyncpa [#allocation3 + $0x1], 1 }
 0x8ff   :  { %1257 = vsyncpa [#allocation6], 1 }
 0x900   :  { %1258 = vsyncpa [#allocation9], 1 }
 0x901   :  { %1259 = vsyncpa [#allocation4], 1 }
 0x902   :  { %1261 = vsyncpa [#allocation4 + $0x1], 1 }

</bundles_post_ra>
